<compile_context>
chip_gen: v5e
topology: v5e:2x2
jax: 0.10.0
libtpu: 0.0.40
codegen_flags: <defaults>
</compile_context>

<pallas_src>
import functools

import jax
import jax.numpy as jnp
from jax.experimental import pallas as pl
from jax.experimental.pallas import tpu as pltpu


def _round_up(n, m):
    return ((n + m - 1) // m) * m


def _round_down(n, m):
    return (n // m) * m


def _vmem_capacity_bytes():
    """Physical VMEM per TensorCore; fall back to the smallest (v7x: 64 MiB)."""
    try:
        cap = getattr(pltpu.get_tpu_info(), "vmem_capacity_bytes", None)
        if cap:
            return int(cap)
    except Exception:
        pass
    return 64 << 20


def _ae_kernel(x_ref,
               w1_ref, b1_ref,
               w2_ref, b2_ref,
               w3_ref, b3_ref,
               w4_ref, b4_ref,
               o_ref,
               *, use_bf16):
    # Matmul operands optionally bf16 (native MXU path); accumulation and all
    # elementwise/sigmoid math stay f32 (v5e has no bf16 VPU/EUP).
    mm_dtype = jnp.bfloat16 if use_bf16 else jnp.float32

    def layer(h, w_ref, b_ref):
        acc = jnp.dot(h.astype(mm_dtype), w_ref[...].astype(mm_dtype),
                      preferred_element_type=jnp.float32)
        return jax.nn.sigmoid(acc + b_ref[...].astype(jnp.float32))

    h = x_ref[...]
    h = layer(h, w1_ref, b1_ref)   # encoder: Linear(nq, 64) -> Sigmoid
    h = layer(h, w2_ref, b2_ref)   #          Linear(64, 8)  -> Sigmoid
    h = layer(h, w3_ref, b3_ref)   # decoder: Linear(8, 64)  -> Sigmoid
    h = layer(h, w4_ref, b4_ref)   #          Linear(64, nq) -> Sigmoid
    o_ref[...] = h.astype(o_ref.dtype)


@functools.partial(jax.jit, static_argnames=("tb", "use_bf16_matmul", "out_dtype"))
def autoencoder_forward(x, params, *, tb=None, use_bf16_matmul=True, out_dtype=None):
    """x: [B, num_question]. params: dict of weights/biases (f32).

    tb: optional batch-tile override (rounded to a multiple of 8).
    out_dtype: output dtype (defaults to x.dtype); bf16 halves output HBM bytes.
    """
    B, nq = x.shape
    out_dtype = x.dtype if out_dtype is None else jnp.dtype(out_dtype)
    in_b = jnp.dtype(x.dtype).itemsize
    out_b = jnp.dtype(out_dtype).itemsize

    w1, b1 = params["w1"], params["b1"]   # [nq, 64], [1, 64]
    w2, b2 = params["w2"], params["b2"]   # [64, 8],  [1, 8]
    w3, b3 = params["w3"], params["b3"]   # [8, 64],  [1, 64]
    w4, b4 = params["w4"], params["b4"]   # [64, nq], [1, nq]

    # ---- VMEM budgeting (layout-padded sizes; no data is actually padded) ----
    nq_lanes = _round_up(nq, 128)
    nq_sub = _round_up(nq, 8)
    vmem_cap = _vmem_capacity_bytes()            # 64 MiB v7x, 128 MiB v5e/v6e
    usable = vmem_cap * 3 // 4                   # keep headroom below physical

    # resident weights/biases (double-buffered by the pipeline), f32, lane-padded
    w_elems = nq_sub * 128 + 64 * 128 + 8 * 128 + 64 * nq_lanes + 4 * 8 * 128
    w_bytes = 2 * 4 * w_elems

    # per-batch-row VMEM: double-buffered x/out tiles + in-kernel temporaries
    # (bf16 copy of the x row, f32 final activation, misc) + hidden activations.
    per_row = nq_lanes * (2 * in_b + 2 * out_b + 2 + 4 + 4) + 4096

    # batch tile: (a) ~4-8 MB per x/out buffer, (b) fits the VMEM budget,
    # (c) at least 2 grid steps so "parallel" spans both TensorCores on v7x.
    target_tile = min(8 << 20, vmem_cap // 16)
    tb_budget = target_tile // (nq_lanes * 4)
    tb_fit = (usable - w_bytes) // per_row
    tb_batch = _round_up(pl.cdiv(B, 2), 8)
    if tb is None:
        tb_eff = max(8, _round_down(min(tb_budget, tb_fit, tb_batch), 8))
    else:
        tb_eff = max(8, _round_up(int(tb), 8))

    grid = (pl.cdiv(B, tb_eff),)                 # partial last block is masked

    vmem_limit = int(min(vmem_cap - (4 << 20),
                         max(16 << 20, w_bytes + tb_eff * per_row + (4 << 20))))

    # ---- advisory cost estimate for the XLA scheduler ------------------------
    flops = 2 * B * (nq * 64 + 64 * 8 + 8 * 64 + 64 * nq)
    transcendentals = B * (64 + 8 + 64 + nq)
    bytes_accessed = B * nq * (in_b + out_b) + w_elems * 4
    cost = pl.CostEstimate(flops=flops, transcendentals=transcendentals,
                           bytes_accessed=bytes_accessed)

    # Weights/biases: one full block, same block index every grid step
    # (stays resident in VMEM, no re-DMA across grid steps).
    def full(arr):
        return pl.BlockSpec(arr.shape, lambda i: (0,) * arr.ndim)

    out = pl.pallas_call(
        functools.partial(_ae_kernel, use_bf16=use_bf16_matmul),
        out_shape=jax.ShapeDtypeStruct((B, nq), out_dtype),
        grid_spec=pltpu.PrefetchScalarGridSpec(
            num_scalar_prefetch=0,
            grid=grid,
            in_specs=[
                pl.BlockSpec((tb_eff, nq), lambda i: (i, 0)),   # x tile
                full(w1), full(b1),
                full(w2), full(b2),
                full(w3), full(b3),
                full(w4), full(b4),
            ],
            out_specs=pl.BlockSpec((tb_eff, nq), lambda i: (i, 0)),
        ),
        compiler_params=pltpu.CompilerParams(
            dimension_semantics=("parallel",),      # batch axis shards across TCs
            vmem_limit_bytes=vmem_limit),
        cost_estimate=cost,
    )(x, w1, b1, w2, b2, w3, b3, w4, b4)

    return out


def init_params(key, num_question):
    """PyTorch Linear default init: U(-1/sqrt(fan_in), +1/sqrt(fan_in))."""
    def linear(key, fan_in, fan_out):
        kw, kb = jax.random.split(key)
        bound = 1.0 / jnp.sqrt(float(fan_in))
        w = jax.random.uniform(kw, (fan_in, fan_out), jnp.float32, -bound, bound)
        b = jax.random.uniform(kb, (1, fan_out), jnp.float32, -bound, bound)
        return w, b

    k1, k2, k3, k4 = jax.random.split(key, 4)
    w1, b1 = linear(k1, num_question, 64)
    w2, b2 = linear(k2, 64, 8)
    w3, b3 = linear(k3, 8, 64)
    w4, b4 = linear(k4, 64, num_question)
    return dict(w1=w1, b1=b1, w2=w2, b2=b2, w3=w3, b3=b3, w4=w4, b4=b4)


def reference_forward(x, p):
    """Pure-JAX reference of the PyTorch forward (f32 everywhere)."""
    h = jax.nn.sigmoid(x @ p["w1"] + p["b1"])
    h = jax.nn.sigmoid(h @ p["w2"] + p["b2"])
    h = jax.nn.sigmoid(h @ p["w3"] + p["b3"])
    return jax.nn.sigmoid(h @ p["w4"] + p["b4"])


if __name__ == "__main__":
    # --- case 1: lane-aligned features, batch spanning >1 grid step -----------
    num_question, batch = 128, 16
    kx, kp = jax.random.split(jax.random.PRNGKey(0))
    x = jax.random.uniform(kx, (batch, num_question), jnp.float32)
    params = init_params(kp, num_question)
    ref = reference_forward(x, params)

    out_f32 = jax.block_until_ready(
        autoencoder_forward(x, params, use_bf16_matmul=False))
    assert out_f32.shape == (batch, num_question)
    assert jnp.allclose(out_f32, ref, atol=1e-5, rtol=1e-5), "f32 mismatch vs reference"

    out_bf16mm = jax.block_until_ready(autoencoder_forward(x, params))  # bf16 MXU path
    assert out_bf16mm.shape == (batch, num_question)
    assert jnp.allclose(out_bf16mm, ref, atol=3e-2, rtol=3e-2), "bf16-MXU mismatch"

    # bf16 I/O path (halves HBM bytes on the mem-bound x/out streams)
    out_bf16io = jax.block_until_ready(
        autoencoder_forward(x.astype(jnp.bfloat16), params, out_dtype=jnp.bfloat16))
    assert out_bf16io.dtype == jnp.bfloat16
    assert jnp.allclose(out_bf16io.astype(jnp.float32), ref, atol=4e-2, rtol=4e-2), \
        "bf16-I/O mismatch"

    # --- case 2: ragged shapes (B % tb != 0, nq % 128 != 0) --------------------
    # Exercises the partial-last-block masking path (no wrapper-side pad/slice).
    num_question2, batch2 = 100, 13
    kx2, kp2 = jax.random.split(jax.random.PRNGKey(1))
    x2 = jax.random.uniform(kx2, (batch2, num_question2), jnp.float32)
    params2 = init_params(kp2, num_question2)
    ref2 = reference_forward(x2, params2)

    out2 = jax.block_until_ready(
        autoencoder_forward(x2, params2, use_bf16_matmul=False))
    assert out2.shape == (batch2, num_question2)
    assert jnp.allclose(out2, ref2, atol=1e-5, rtol=1e-5), "ragged-shape mismatch"

    print("KERNEL_OK")
</pallas_src>

<mosaic_0001>
module attributes {stable_mosaic.version = 11 : i64} {
  func.func @_ae_kernel(%arg0: i32, %arg1: memref<8x128xf32, #tpu.memory_space<vmem>>, %arg2: memref<128x64xf32, #tpu.memory_space<vmem>>, %arg3: memref<1x64xf32, #tpu.memory_space<vmem>>, %arg4: memref<64x8xf32, #tpu.memory_space<vmem>>, %arg5: memref<1x8xf32, #tpu.memory_space<vmem>>, %arg6: memref<8x64xf32, #tpu.memory_space<vmem>>, %arg7: memref<1x64xf32, #tpu.memory_space<vmem>>, %arg8: memref<64x128xf32, #tpu.memory_space<vmem>>, %arg9: memref<1x128xf32, #tpu.memory_space<vmem>>, %arg10: memref<8x128xf32, #tpu.memory_space<vmem>>) attributes {dimension_semantics = [#tpu.dimension_semantics<parallel>], iteration_bounds = array<i64: 2>, scalar_prefetch = 0 : i64, scratch_operands = 0 : i64, tpu.core_type = #tpu.core_type<tc>, window_params = [{transform_indices = @transform_0, window_bounds = array<i64: 8, 128>}, {pipeline_mode = #tpu.pipeline_mode<synchronous>, transform_indices = @transform_1, window_bounds = array<i64: 128, 64>}, {pipeline_mode = #tpu.pipeline_mode<synchronous>, transform_indices = @transform_2, window_bounds = array<i64: 1, 64>}, {pipeline_mode = #tpu.pipeline_mode<synchronous>, transform_indices = @transform_3, window_bounds = array<i64: 64, 8>}, {pipeline_mode = #tpu.pipeline_mode<synchronous>, transform_indices = @transform_4, window_bounds = array<i64: 1, 8>}, {pipeline_mode = #tpu.pipeline_mode<synchronous>, transform_indices = @transform_5, window_bounds = array<i64: 8, 64>}, {pipeline_mode = #tpu.pipeline_mode<synchronous>, transform_indices = @transform_6, window_bounds = array<i64: 1, 64>}, {pipeline_mode = #tpu.pipeline_mode<synchronous>, transform_indices = @transform_7, window_bounds = array<i64: 64, 128>}, {pipeline_mode = #tpu.pipeline_mode<synchronous>, transform_indices = @transform_8, window_bounds = array<i64: 1, 128>}, {transform_indices = @transform_9, window_bounds = array<i64: 8, 128>}]} {
    %c0 = arith.constant 0 : index
    %c0_0 = arith.constant 0 : index
    %0 = vector.load %arg1[%c0, %c0_0] : memref<8x128xf32, #tpu.memory_space<vmem>>, vector<8x128xf32>
    %c0_1 = arith.constant 0 : index
    %c0_2 = arith.constant 0 : index
    %1 = vector.load %arg2[%c0_1, %c0_2] : memref<128x64xf32, #tpu.memory_space<vmem>>, vector<128x64xf32>
    %cst = arith.constant dense<0.000000e+00> : vector<8x64xf32>
    %2 = tpu.matmul %0, %1, %cst {dimension_numbers = #tpu.dot_dimension_numbers<[1], [0], [0], [1], [0, 0, 1, 1], [], []>} : vector<8x128xf32>, vector<128x64xf32>, vector<8x64xf32> -> vector<8x64xf32>
    %c0_3 = arith.constant 0 : index
    %c0_4 = arith.constant 0 : index
    %3 = vector.load %arg3[%c0_3, %c0_4] : memref<1x64xf32, #tpu.memory_space<vmem>>, vector<1x64xf32>
    %4 = vector.broadcast %3 : vector<1x64xf32> to vector<8x64xf32>
    %5 = arith.addf %2, %4 : vector<8x64xf32>
    %6 = arith.negf %5 : vector<8x64xf32>
    %7 = math.exp %6 : vector<8x64xf32>
    %cst_5 = arith.constant 1.000000e+00 : f32
    %8 = vector.broadcast %cst_5 : f32 to vector<8x64xf32>
    %9 = arith.addf %8, %7 : vector<8x64xf32>
    %10 = arith.divf %8, %9 : vector<8x64xf32>
    %c0_6 = arith.constant 0 : index
    %c0_7 = arith.constant 0 : index
    %11 = vector.load %arg4[%c0_6, %c0_7] : memref<64x8xf32, #tpu.memory_space<vmem>>, vector<64x8xf32>
    %cst_8 = arith.constant dense<0.000000e+00> : vector<8x8xf32>
    %12 = tpu.matmul %10, %11, %cst_8 {dimension_numbers = #tpu.dot_dimension_numbers<[1], [0], [0], [1], [0, 0, 1, 1], [], []>} : vector<8x64xf32>, vector<64x8xf32>, vector<8x8xf32> -> vector<8x8xf32>
    %c0_9 = arith.constant 0 : index
    %c0_10 = arith.constant 0 : index
    %13 = vector.load %arg5[%c0_9, %c0_10] : memref<1x8xf32, #tpu.memory_space<vmem>>, vector<1x8xf32>
    %14 = vector.broadcast %13 : vector<1x8xf32> to vector<8x8xf32>
    %15 = arith.addf %12, %14 : vector<8x8xf32>
    %16 = arith.negf %15 : vector<8x8xf32>
    %17 = math.exp %16 : vector<8x8xf32>
    %cst_11 = arith.constant 1.000000e+00 : f32
    %18 = vector.broadcast %cst_11 : f32 to vector<8x8xf32>
    %19 = arith.addf %18, %17 : vector<8x8xf32>
    %20 = arith.divf %18, %19 : vector<8x8xf32>
    %c0_12 = arith.constant 0 : index
    %c0_13 = arith.constant 0 : index
    %21 = vector.load %arg6[%c0_12, %c0_13] : memref<8x64xf32, #tpu.memory_space<vmem>>, vector<8x64xf32>
    %cst_14 = arith.constant dense<0.000000e+00> : vector<8x64xf32>
    %22 = tpu.matmul %20, %21, %cst_14 {dimension_numbers = #tpu.dot_dimension_numbers<[1], [0], [0], [1], [0, 0, 1, 1], [], []>} : vector<8x8xf32>, vector<8x64xf32>, vector<8x64xf32> -> vector<8x64xf32>
    %c0_15 = arith.constant 0 : index
    %c0_16 = arith.constant 0 : index
    %23 = vector.load %arg7[%c0_15, %c0_16] : memref<1x64xf32, #tpu.memory_space<vmem>>, vector<1x64xf32>
    %24 = vector.broadcast %23 : vector<1x64xf32> to vector<8x64xf32>
    %25 = arith.addf %22, %24 : vector<8x64xf32>
    %26 = arith.negf %25 : vector<8x64xf32>
    %27 = math.exp %26 : vector<8x64xf32>
    %cst_17 = arith.constant 1.000000e+00 : f32
    %28 = vector.broadcast %cst_17 : f32 to vector<8x64xf32>
    %29 = arith.addf %28, %27 : vector<8x64xf32>
    %30 = arith.divf %28, %29 : vector<8x64xf32>
    %c0_18 = arith.constant 0 : index
    %c0_19 = arith.constant 0 : index
    %31 = vector.load %arg8[%c0_18, %c0_19] : memref<64x128xf32, #tpu.memory_space<vmem>>, vector<64x128xf32>
    %cst_20 = arith.constant dense<0.000000e+00> : vector<8x128xf32>
    %32 = tpu.matmul %30, %31, %cst_20 {dimension_numbers = #tpu.dot_dimension_numbers<[1], [0], [0], [1], [0, 0, 1, 1], [], []>} : vector<8x64xf32>, vector<64x128xf32>, vector<8x128xf32> -> vector<8x128xf32>
    %c0_21 = arith.constant 0 : index
    %c0_22 = arith.constant 0 : index
    %33 = vector.load %arg9[%c0_21, %c0_22] : memref<1x128xf32, #tpu.memory_space<vmem>>, vector<1x128xf32>
    %34 = vector.broadcast %33 : vector<1x128xf32> to vector<8x128xf32>
    %35 = arith.addf %32, %34 : vector<8x128xf32>
    %36 = arith.negf %35 : vector<8x128xf32>
    %37 = math.exp %36 : vector<8x128xf32>
    %cst_23 = arith.constant 1.000000e+00 : f32
    %38 = vector.broadcast %cst_23 : f32 to vector<8x128xf32>
    %39 = arith.addf %38, %37 : vector<8x128xf32>
    %40 = arith.divf %38, %39 : vector<8x128xf32>
    %c0_24 = arith.constant 0 : index
    %c0_25 = arith.constant 0 : index
    %41 = vector.load %arg10[%c0_24, %c0_25] : memref<8x128xf32, #tpu.memory_space<vmem>>, vector<8x128xf32>
    tpu.vector_store %arg10[%c0_24, %c0_25], %40 {strides = array<i32>} : memref<8x128xf32, #tpu.memory_space<vmem>>, vector<8x128xf32>,
    return
  }
  func.func @transform_0(%arg0: i32) -> (i32, i32) {
    %c0_i32 = arith.constant 0 : i32
    %c0_i32_0 = arith.constant 0 : i32
    return %arg0, %c0_i32 : i32, i32
  }
  func.func @transform_1(%arg0: i32) -> (i32, i32) {
    %c0_i32 = arith.constant 0 : i32
    %c0_i32_0 = arith.constant 0 : i32
    %c0_i32_1 = arith.constant 0 : i32
    return %c0_i32, %c0_i32_0 : i32, i32
  }
  func.func @transform_2(%arg0: i32) -> (i32, i32) {
    %c0_i32 = arith.constant 0 : i32
    %c0_i32_0 = arith.constant 0 : i32
    %c0_i32_1 = arith.constant 0 : i32
    return %c0_i32, %c0_i32_0 : i32, i32
  }
  func.func @transform_3(%arg0: i32) -> (i32, i32) {
    %c0_i32 = arith.constant 0 : i32
    %c0_i32_0 = arith.constant 0 : i32
    %c0_i32_1 = arith.constant 0 : i32
    return %c0_i32, %c0_i32_0 : i32, i32
  }
  func.func @transform_4(%arg0: i32) -> (i32, i32) {
    %c0_i32 = arith.constant 0 : i32
    %c0_i32_0 = arith.constant 0 : i32
    %c0_i32_1 = arith.constant 0 : i32
    return %c0_i32, %c0_i32_0 : i32, i32
  }
  func.func @transform_5(%arg0: i32) -> (i32, i32) {
    %c0_i32 = arith.constant 0 : i32
    %c0_i32_0 = arith.constant 0 : i32
    %c0_i32_1 = arith.constant 0 : i32
    return %c0_i32, %c0_i32_0 : i32, i32
  }
  func.func @transform_6(%arg0: i32) -> (i32, i32) {
    %c0_i32 = arith.constant 0 : i32
    %c0_i32_0 = arith.constant 0 : i32
    %c0_i32_1 = arith.constant 0 : i32
    return %c0_i32, %c0_i32_0 : i32, i32
  }
  func.func @transform_7(%arg0: i32) -> (i32, i32) {
    %c0_i32 = arith.constant 0 : i32
    %c0_i32_0 = arith.constant 0 : i32
    %c0_i32_1 = arith.constant 0 : i32
    return %c0_i32, %c0_i32_0 : i32, i32
  }
  func.func @transform_8(%arg0: i32) -> (i32, i32) {
    %c0_i32 = arith.constant 0 : i32
    %c0_i32_0 = arith.constant 0 : i32
    %c0_i32_1 = arith.constant 0 : i32
    return %c0_i32, %c0_i32_0 : i32, i32
  }
  func.func @transform_9(%arg0: i32) -> (i32, i32) {
    %c0_i32 = arith.constant 0 : i32
    %c0_i32_0 = arith.constant 0 : i32
    return %arg0, %c0_i32 : i32, i32
  }
}

</mosaic_0001>

<bundles_post_ra>
// kernel: autoencoder_forward.1
= control target key start
LH: loop header
LB: loop body
LE: loop exit
PB: predicated region body
PF: predicated region fallthrough
CT: control target
= control target key end

     0   :  { %14 = vsyncpa [#allocation3], 0  ;;  %s1009_s0 = inlined_call_operand.vmem [shape: f32[16,128], index: 0, kind: input, shape index: {}]   ;;  %s1010_s1 = inlined_call_operand.vmem [shape: f32[128,64], index: 1, kind: input, shape index: {}]   ;;  %s1011_s2 = inlined_call_operand.vmem [shape: f32[1,64], index: 2, kind: input, shape index: {}]   ;;  %s1012_s3 = inlined_call_operand.vmem [shape: f32[64,8], index: 3, kind: input, shape index: {}]   ;;  %s1013_s4 = inlined_call_operand.vmem [shape: f32[1,8], index: 4, kind: input, shape index: {}]   ;;  %s1014_s5 = inlined_call_operand.vmem [shape: f32[8,64], index: 5, kind: input, shape index: {}]   ;;  %s1015_s6 = inlined_call_operand.vmem [shape: f32[1,64], index: 6, kind: input, shape index: {}]   ;;  %s1016_s7 = inlined_call_operand.vmem [shape: f32[64,128], index: 7, kind: input, shape index: {}]   ;;  %s1017_s8 = inlined_call_operand.vmem [shape: f32[1,128], index: 8, kind: input, shape index: {}]   ;;  %s1018_s9 = inlined_call_operand.hbm [shape: f32[16,128], index: 9, kind: output, shape index: {}]  }
   0x1   :  { %16 = vsyncpa [#allocation3 + $0x1], 0  ;;  %s811_s30 = smov 0   ;;  %s813_s10 = smov 0  }
   0x2   :  { %s815_s11 = smov 0   ;;  %s817_s12 = smov 0  }
   0x3 LB: > { %s832_s13 = sadd.s32 4294967295, %s759_s12   ;;  %s621_s14 = sadd.s32 4294967294, %s759_s12   ;;  %s759_s12 = sphi %s817_s12, %s1026_s12   ;;  %s755_s11 = sphi %s815_s11, %s1025_s11   ;;  %s751_s10 = sphi %s813_s10, %s1024_s10   ;;  %s747_s30 = sphi %s811_s30, %s1023_s30  }
   0x4   : > { %s836_s15 = sadd.s32 1, %s759_s12   ;;  %s223_s16 = sadd.s32 1, %s755_s11 }
   0x5   : > { %s220_s17 = ssub.s32 %s759_s12, %s836_s15  ;;  %p233_p0 = scmp.ne.s32.totalorder %s755_s11, %s751_s10 }
   0x6   : > { %p221_p1 = scmp.eq.s32.totalorder %s220_s17, 0  ;;  %p234_p2 = scmp.eq.s32.totalorder %s832_s13, 1 }
   0x7   : > { %p239_p3 = scmp.ne.s32.totalorder %s751_s10, %s747_s30  ;;  %p240_p4 = scmp.eq.s32.totalorder %s621_s14, 1 }
   0x8   : > { %s847_s18 = scalar_select %p221_p1, %s755_s11, %s223_s16  }
   0x9   : > { %p849_p5 = por %p234_p2, %p233_p0  ;;  %p853_p6 = por %p240_p4, %p239_p3 }
   0xa   : > { %1019 = sst [smem:[#allocation5_spill]] %s847_s18  ;;  %p624_p7 = scmp.ge.s32.totalorder %s759_s12, 1 }
   0xb   : > { %p289_p8 = scmp.lt.s32.totalorder %s759_s12, 3 }
   0xd   : > { %p290_p9 = pnand %p624_p7, %p289_p8 }
   0xe   : > { %p324_p10 = scmp.lt.s32.totalorder (!%p290_p9), %s832_s13, 1  ;;  %s321_s25 = sand.u32 (!%p290_p9), 1, %s751_s10  }
   0xf   : > { %293 = sbr.rel (%p290_p9) target bundleno = 691 (0x2b3), region = 56  ;;  %s625_s26 = sshll.u32 (!%p290_p9), %s321_s25, 3 }
  0x10   : > { %s323_s29 = scalar_lea.vmem (!%p290_p9), [#allocation2], %s625_s26  ;;  %s717_s26 = scalar_lea.hbm (!%p290_p9), %s1018_s9, 16 }
  0x11   : > { %s559_s14 = sshll.u32 (!%p290_p9), %s323_s29, 4  ;;  %s560_s14 = int_to_ptr.vmem [resolvable:$true] %s559_s14 }
  0x14   : > { %v344_v0 = vld [vmem:[%s1010_s1 + $0x78] sm:$0xff]  ;;  %v343_v1 = vld [vmem:[%s1010_s1 + $0x70] sm:$0xff]  ;;  %v342_v2 = vld [vmem:[%s1010_s1 + $0x68] sm:$0xff]  ;;  %s325_s16 = scalar_select %p324_p10, %s832_s13, 1  ;;  %vm400_vm3 = vcmask 523264   ;;  %vm448_vm8 = vcmask 64512  }
  0x15   : > { %349 = vmatpush.msra.mxu0 %v344_v0  ;;  %v341_v3 = vld [vmem:[%s1010_s1 + $0x60] sm:$0xff]  ;;  %v340_v4 = vld [vmem:[%s1010_s1 + $0x58] sm:$0xff]  ;;  %v339_v5 = vld [vmem:[%s1010_s1 + $0x50] sm:$0xff] }
  0x16   : > { %v338_v6 = vld [vmem:[%s1010_s1 + $0x48] sm:$0xff]  ;;  %v337_v7 = vld [vmem:[%s1010_s1 + $0x40] sm:$0xff]  ;;  %v336_v8 = vld [vmem:[%s1010_s1 + $0x38] sm:$0xff]  ;;  %s626_s24 = sshll.u32 %s325_s16, 3 }
  0x17   : > { %350 = vmatpush.msra.mxu0 %v343_v1  ;;  %v335_v9 = vld [vmem:[%s1010_s1 + $0x30] sm:$0xff]  ;;  %v334_v10 = vld [vmem:[%s1010_s1 + $0x28] sm:$0xff]  ;;  %v333_v11 = vld [vmem:[%s1010_s1 + $0x20] sm:$0xff]  ;;  %s327_s17 = scalar_lea.vmem %s1009_s0, %s626_s24  ;;  %s635_s24 = sshll.u32 %s832_s13, 3 }
  0x18   : > { %v332_v12 = vld [vmem:[%s1010_s1 + $0x18] sm:$0xff]  ;;  %v331_v13 = vld [vmem:[%s1010_s1 + $0x10] sm:$0xff]  ;;  %v330_v14 = vld [vmem:[%s1010_s1 + $0x8] sm:$0xff]  ;;  %s557_s28 = scalar_lea.hbm %s1018_s9, %s635_s24  ;;  %s547_s13 = scalar_lea.sflag [#allocation3], %s321_s25 }
  0x19   : > { %351 = vmatpush.msra.mxu0 %v342_v2  ;;  %v329_v15 = vld [vmem:[%s1010_s1] sm:$0xff]  ;;  %v395_v17 = vld [vmem:[%s1012_s3 + $0x38] sm:$0xff]  ;;  %v394_v18 = vld [vmem:[%s1012_s3 + $0x30] sm:$0xff] }
  0x1a   : > { %v328_v16 = vld [vmem:[%s327_s17] sm:$0xff]  ;;  %412 = vmatpush.msra.mxu1 %v395_v17  ;;  %v393_v19 = vld [vmem:[%s1012_s3 + $0x28] sm:$0xff]  ;;  %v391_v21 = vld [vmem:[%s1012_s3 + $0x18] sm:$0xff]  ;;  %s561_s17 = sshll.u32 %s557_s28, 4  ;;  %s562_s17 = int_to_ptr.hbm [resolvable:$true] %s561_s17 }
  0x1b   : > { %352 = vmatpush.msra.mxu0 %v341_v3  ;;  %v392_v20 = vld [vmem:[%s1012_s3 + $0x20] sm:$0xff]  ;;  %v390_v22 = vld [vmem:[%s1012_s3 + $0x10] sm:$0xff]  ;;  %v389_v23 = vld [vmem:[%s1012_s3 + $0x8] sm:$0xff]  ;;  %s711_s21 = sshra.s32 %s562_s17, 4  ;;  %s712_s21 = int_to_ptr.hbm [resolvable:$true] %s711_s21 }
  0x1c   : > { %413 = vmatpush.msra.mxu1 %v394_v18  ;;  %v388_v24 = vld [vmem:[%s1012_s3] sm:$0xff]  ;;  %v498_v58 = vld [vmem:[%s1016_s7 + $0x38] sm:$0xff]  ;;  %v497_v59 = vld [vmem:[%s1016_s7 + $0x30] sm:$0xff]  ;;  %s713_s16 = scalar_lea.hbm %s712_s21, 8  ;;  %p718_p0 = scmp.lt.s32.totalorder %s712_s21, %s1018_s9 }
  0x1d   : > { %353 = vmatpush.msra.mxu0 %v340_v4  ;;  %v677_v25 = vld [vmem:[%s1011_s2] ss:$0 sm:$0xff]  ;;  %514 = vmatpush.msra.mxu3 %v498_v58  ;;  %v496_v60 = vld [vmem:[%s1016_s7 + $0x28] sm:$0xff]  ;;  %v494_v62 = vld [vmem:[%s1016_s7 + $0x18] sm:$0xff]  ;;  %p714_p11 = scmp.ne.s32.totalorder %s712_s21, %s713_s16  ;;  %p719_p1 = scmp.lt.s32.totalorder %s717_s26, %s713_s16 }
  0x1e   : > { %414 = vmatpush.msra.mxu1 %v393_v19  ;;  %v443_v41 = vld [vmem:[%s1014_s5] sm:$0xff]  ;;  %v493_v63 = vld [vmem:[%s1016_s7 + $0x10] sm:$0xff]  ;;  %v492_v0 = vld [vmem:[%s1016_s7 + $0x8] sm:$0xff] }
  0x1f   : > { %354 = vmatpush.msra.mxu0 %v339_v5  ;;  %467 = vmatpush.msra.mxu2 %v443_v41  ;;  %v678_v42 = vld [vmem:[%s1013_s4] ss:$0 sm:$0xff]  ;;  %p715_p12 = pnand %p714_p11, %p849_p5  ;;  %p720_p2 = por %p719_p1, %p718_p0 }
  0x20   : > { %415 = vmatpush.msra.mxu1 %v392_v20  ;;  %515 = vmatpush.msra.mxu3 %v497_v59  ;;  %v495_v61 = vld [vmem:[%s1016_s7 + $0x20] sm:$0xff] }
  0x21   : > { %355 = vmatpush.msra.mxu0 %v338_v6  ;;  %v491_v1 = vld [vmem:[%s1016_s7] sm:$0xff]  ;;  %p716_p13 = pneg %p715_p12 }
  0x22   : > { %416 = vmatpush.msra.mxu1 %v391_v21  ;;  %516 = vmatpush.msra.mxu3 %v496_v60  ;;  %v679_v2 = vld [vmem:[%s1015_s6] ss:$0 sm:$0xff] }
  0x23   : > { %356 = vmatpush.msra.mxu0 %v337_v7  ;;  %v680_v18 = vld [vmem:[%s1017_s8] ss:$0 sm:$0xff]  ;;  %p721_p3 = pnand %p720_p2, %p716_p13 }
  0x24   : > { %417 = vmatpush.msra.mxu1 %v390_v22  ;;  %517 = vmatpush.msra.mxu3 %v495_v61 }
  0x25   : > { %357 = vmatpush.msra.mxu0 %v336_v8 }
  0x26   : > { %418 = vmatpush.msra.mxu1 %v389_v23  ;;  %518 = vmatpush.msra.mxu3 %v494_v62 }
  0x27   : > { %358 = vmatpush.msra.mxu0 %v335_v9 }
  0x28   : > { %419 = vmatpush.msra.mxu1 %v388_v24  ;;  %519 = vmatpush.msra.mxu3 %v493_v63 }
  0x29   : > { %359 = vmatpush.msra.mxu0 %v334_v10 }
  0x2a   : > { %520 = vmatpush.msra.mxu3 %v492_v0 }
  0x2b   : > { %360 = vmatpush.msra.mxu0 %v333_v11 }
  0x2c   : > { %521 = vmatpush.msra.mxu3 %v491_v1 }
  0x2d   : > { %361 = vmatpush.msra.mxu0 %v332_v12 }
  0x2f   : > { %362 = vmatpush.msra.mxu0 %v331_v13 }
  0x31   : > { %363 = vmatpush.msra.mxu0 %v330_v14 }
  0x33   : > { %364 = vmatpush.msra.mxu0 %v329_v15 }
  0x34   : > { %365 = vmatmul.f32.vlgmr.msra.gmra.mxu0 %v328_v16 }
  0xb1   : > { %v366_v26 = vpop.f32.mrf.mxu0 }
  0xb2   : > { %v367_v27 = vadd.f32 %v677_v25, %v366_v26 }
  0xb4   : > { %v627_v28 = vmul.f32 -1.442695, %v367_v27 }
  0xb6   : > { %681 = vpow2.f32 %v627_v28 }
  0xbc   : > { %v682_v29 = vpop.eup %681 }
  0xbd   : > { %v372_v30 = vadd.f32 1.0, %v682_v29 }
  0xbf   : > { %683 = vrcp.f32 %v372_v30  ;;  %v384_v34 = vand.u32 2147483648, %v372_v30  ;;  %v382_v36 = vand.u32 2147483647, %v372_v30  ;;  %vm378_vm1 = vweird.f32 %v372_v30 }
  0xc1   : > { %v385_v38 = vor.u32 1.1754944e-38, %v384_v34  ;;  %vm383_vm4 = vcmp.eq.f32.partialorder %v382_v36, 8.507059e+37 }
  0xc5   : > { %v684_v31 = vpop.eup %683 }
  0xc6   : > { %v374_v32 = vmul.f32 %v684_v31, %v372_v30  ;;  %vm379_vm0 = vweird.f32 %v684_v31 }
  0xc7   : > { %vm380_vm2 = vmor %vm378_vm1, %vm379_vm0 }
  0xc8   : > { %v375_v33 = vsub.f32 1.0, %v374_v32 }
  0xca   : > { %v376_v35 = vmul.f32 %v684_v31, %v375_v33 }
  0xcc   : > { %v377_v37 = vadd.f32 %v684_v31, %v376_v35 }
  0xce   : > { %v381_v39 = vsel %vm380_vm2, %v684_v31, %v377_v37 }
  0xcf   : > { %v386_v40 = vsel %vm383_vm4, %v385_v38, %v381_v39 }
  0xd0   : > { %628 = vmatmul.msk.f32.vlgmr.msra.gmra.mxu1 %vm400_vm3, %v386_v40 }
 0x14d   : > { %v421_v43 = vpop.f32.mrf.mxu1 }
 0x14e   : > { %v422_v44 = vadd.f32 %v678_v42, %v421_v43 }
 0x150   : > { %v629_v45 = vmul.f32 -1.442695, %v422_v44 }
 0x152   : > { %685 = vpow2.f32 %v629_v45 }
 0x158   : > { %v686_v46 = vpop.eup %685 }
 0x159   : > { %v427_v47 = vadd.f32 1.0, %v686_v46 }
 0x15b   : > { %687 = vrcp.f32 %v427_v47  ;;  %v439_v51 = vand.u32 2147483648, %v427_v47  ;;  %v437_v53 = vand.u32 2147483647, %v427_v47  ;;  %vm433_vm6 = vweird.f32 %v427_v47 }
 0x15d   : > { %v440_v55 = vor.u32 1.1754944e-38, %v439_v51  ;;  %vm438_vm9 = vcmp.eq.f32.partialorder %v437_v53, 8.507059e+37 }
 0x161   : > { %v688_v48 = vpop.eup %687 }
 0x162   : > { %v429_v49 = vmul.f32 %v688_v48, %v427_v47  ;;  %vm434_vm5 = vweird.f32 %v688_v48 }
 0x163   : > { %vm435_vm7 = vmor %vm433_vm6, %vm434_vm5 }
 0x164   : > { %v430_v50 = vsub.f32 1.0, %v429_v49 }
 0x166   : > { %v431_v52 = vmul.f32 %v688_v48, %v430_v50 }
 0x168   : > { %v432_v54 = vadd.f32 %v688_v48, %v431_v52 }
 0x16a   : > { %v436_v56 = vsel %vm435_vm7, %v688_v48, %v432_v54 }
 0x16b   : > { %v441_v57 = vsel %vm438_vm9, %v440_v55, %v436_v56 }
 0x16c   : > { %630 = vmatmul.msk.f32.vlgmr.msra.gmra.mxu2 %vm448_vm8, %v441_v57 }
 0x1ef   : > { %v469_v3 = vpop.f32.mrf.mxu2 }
 0x1f0   : > { %v470_v4 = vadd.f32 %v679_v2, %v469_v3 }
 0x1f2   : > { %v631_v5 = vmul.f32 -1.442695, %v470_v4 }
 0x1f4   : > { %689 = vpow2.f32 %v631_v5 }
 0x1fa   : > { %v690_v6 = vpop.eup %689 }
 0x1fb   : > { %v475_v7 = vadd.f32 1.0, %v690_v6 }
 0x1fd   : > { %691 = vrcp.f32 %v475_v7  ;;  %v487_v11 = vand.u32 2147483648, %v475_v7  ;;  %v485_v13 = vand.u32 2147483647, %v475_v7  ;;  %vm481_vm11 = vweird.f32 %v475_v7 }
 0x1ff   : > { %v488_v15 = vor.u32 1.1754944e-38, %v487_v11  ;;  %vm486_vm13 = vcmp.eq.f32.partialorder %v485_v13, 8.507059e+37 }
 0x203   : > { %v692_v8 = vpop.eup %691 }
 0x204   : > { %v477_v9 = vmul.f32 %v692_v8, %v475_v7  ;;  %vm482_vm10 = vweird.f32 %v692_v8 }
 0x205   : > { %vm483_vm12 = vmor %vm481_vm11, %vm482_vm10 }
 0x206   : > { %v478_v10 = vsub.f32 1.0, %v477_v9 }
 0x208   : > { %v479_v12 = vmul.f32 %v692_v8, %v478_v10 }
 0x20a   : > { %v480_v14 = vadd.f32 %v692_v8, %v479_v12 }
 0x20c   : > { %v484_v16 = vsel %vm483_vm12, %v692_v8, %v480_v14 }
 0x20d   : > { %v489_v17 = vsel %vm486_vm13, %v488_v15, %v484_v16 }
 0x20e   : > { %632 = vmatmul.msk.f32.vlgmr.msra.gmra.mxu3 %vm400_vm3, %v489_v17 }
 0x291   : > { %v523_v19 = vpop.f32.mrf.mxu3 }
 0x292   : > { %v524_v20 = vadd.f32 %v680_v18, %v523_v19 }
 0x294   : > { %v633_v21 = vmul.f32 -1.442695, %v524_v20 }
 0x296   : > { %693 = vpow2.f32 %v633_v21 }
 0x29c   : > { %v694_v22 = vpop.eup %693 }
 0x29d   : > { %v529_v23 = vadd.f32 1.0, %v694_v22 }
 0x29f   : > { %695 = vrcp.f32 %v529_v23  ;;  %v541_v27 = vand.u32 2147483648, %v529_v23  ;;  %v539_v29 = vand.u32 2147483647, %v529_v23  ;;  %vm535_vm15 = vweird.f32 %v529_v23 }
 0x2a1   : > { %v542_v31 = vor.u32 1.1754944e-38, %v541_v27  ;;  %vm540_vm1 = vcmp.eq.f32.partialorder %v539_v29, 8.507059e+37 }
 0x2a5   : > { %v696_v24 = vpop.eup %695 }
 0x2a6   : > { %v531_v25 = vmul.f32 %v696_v24, %v529_v23  ;;  %vm536_vm14 = vweird.f32 %v696_v24 }
 0x2a7   : > { %vm537_vm0 = vmor %vm535_vm15, %vm536_vm14 }
 0x2a8   : > { %v532_v26 = vsub.f32 1.0, %v531_v25 }
 0x2aa   : > { %v533_v28 = vmul.f32 %v696_v24, %v532_v26 }
 0x2ac   : > { %v534_v30 = vadd.f32 %v696_v24, %v533_v28 }
 0x2ae   : > { %v538_v32 = vsel %vm537_vm0, %v696_v24, %v534_v30 }
 0x2af   : > { %v543_v33 = vsel %vm540_vm1, %v542_v31, %v538_v32 }
 0x2b0   : > { %545 = vst [vmem:[%s323_s29] sm:$0xff] %v543_v33 }
 0x2b1   : > { %724 = shalt.err (!%p721_p3)
}
 0x2b2   : > { %638 = dma.vmem_to_hbm [thread:$0]  (%p849_p5), %s560_s14, 128, %s562_s17, %s547_s13  }
 0x2b3 PF: > { %p644_p4 = scmp.ge.s32.totalorder %s759_s12, 2  ;;  %s573_s25 = sand.u32 1, %s747_s30  }
 0x2b4   : > { %s574_s27 = scalar_lea.sflag [#allocation3], %s573_s25 }
 0x2b5   : > { %p641_p7 = pnand %p644_p4, %p853_p6 }
 0x2b7   : > { %p642_p8 = pneg %p641_p7 }
 0x2b9   : > { %742 = dma.done.wait (%p642_p8), %s574_s27, 128  }
 0x2ba   : > { %744 = vsyncadd (%p642_p8), %s574_s27, 4294967168  ;;  %s1022_s28 = sld [smem:[#allocation5_spill]]  ;;  %p19_p9 = scmp.ge.s32.totalorder %s836_s15, 4  }
 0x2bb   : > { %s1023_s30 = smov %s751_s10  ;;  %s1024_s10 = smov %s755_s11 }
 0x2bc   : > { %s1026_s12 = smov %s836_s15  ;;  %21 = sbr.rel (!%p19_p9) target bundleno = 3 (0x3), region = 91 }
 0x2c0   : > { %s1025_s11 = smov %s1022_s28 }
 0x2c1   :  { %580 = vsyncpa [#allocation3], 1 }
 0x2c2   :  { %582 = vsyncpa [#allocation3 + $0x1], 1 }

</bundles_post_ra>
